<compile_context>
chip_gen: v7x
topology: tpu7x:2x2x1
jax: 0.10.0
libtpu: 0.0.40
codegen_flags: <defaults>
</compile_context>

<pallas_src>
from functools import partial

import jax
import jax.numpy as jnp
import numpy as np
from jax import lax
from jax.experimental import pallas as pl
from jax.experimental.pallas import tpu as pltpu


def _round_up(x, m):
    return (x + m - 1) // m * m


def _lora_kernel(x_ref, wd_ref, wu_ref, o_ref, *, scale):
    # x_ref:  (TM, in_features)      original input dtype
    # wd_ref: (rank, in_features)    down.weight (weight/compute dtype)
    # wu_ref: (rank, out_features)   up.weight.T
    # o_ref:  (TM, out_features)     original input dtype
    compute_dtype = wd_ref.dtype
    x = x_ref[...].astype(compute_dtype)                        # .to(dtype)
    # x @ down.weight.T : contract in_features (axis 1 of x with axis 1 of wd).
    # TODO(synk): verify via pl.lower_as_mlir that this trans-B contraction
    # does not emit a per-step XLU transpose of the weight tile.
    down = lax.dot_general(
        x, wd_ref[...],
        dimension_numbers=(((1,), (1,)), ((), ())),
        preferred_element_type=jnp.float32)                     # self.down(x)
    up = jnp.dot(down.astype(compute_dtype), wu_ref[...],
                 preferred_element_type=jnp.float32)            # self.up(down)
    if scale is not None:
        up = up * jnp.float32(scale)                            # alpha / rank (f32, exact)
    o_ref[...] = up.astype(o_ref.dtype)                         # .to(orig_dtype)


def _vmem_limit_and_budget():
    """Generation-aware scoped-VMEM limit and tile budget (bytes)."""
    try:
        cap = int(pltpu.get_tpu_info().vmem_capacity_bytes)
    except Exception:
        cap = 64 * 1024 * 1024  # conservative fallback (v7x per-TC size)
    if cap >= 96 * 1024 * 1024:
        # v5e / v6e: 128 MiB physical VMEM.
        return 100 * 1024 * 1024, 92 * 1024 * 1024, False
    # v7x: 64 MiB per TensorCore, 2 TCs per chip -> leave Mosaic headroom.
    return 44 * 1024 * 1024, 38 * 1024 * 1024, True


def _choose_tile_m(M, per_row_bytes, weight_bytes, budget_bytes, dual_core):
    """Pick the row tile: as big as the VMEM budget allows, 8-aligned."""
    avail = max(budget_bytes - weight_bytes, 1 << 20)
    tm = max(avail // max(per_row_bytes, 1), 8)
    # Allow 2048-row tiles for narrow rows so each grid step still moves
    # several MiB (amortizes the ~0.35us/step pipeline overhead).
    tm = min(tm, 2048 if per_row_bytes <= 4096 else 1024)
    if M >= 16:
        if dual_core:
            # At least one tile per TensorCore.
            tm = min(tm, _round_up(-(-M // 2), 8))
        else:
            # Single TC: 2 steps suffice for DMA/compute overlap; never shrink
            # the tile below 512 rows just to create grid steps.
            tm = min(tm, max(512, _round_up(-(-M // 2), 8)))
    tm = min(tm, _round_up(M, 8))
    tm = max(8, (tm // 8) * 8)
    if dual_core and M > tm:
        # Even step count so neither core idles on the final step.
        steps = -(-M // tm)
        if steps % 2 == 1:
            steps += 1
            tm = max(8, _round_up(-(-M // steps), 8))
    return int(tm)


@partial(jax.jit, static_argnames=("network_alpha",))
def lora_linear_forward(hidden_states, down_weight, up_weight, network_alpha=None):
    """Pallas implementation of LoRALinearLayer.forward.

    hidden_states: (..., in_features), any float dtype
    down_weight:   (rank, in_features)   (nn.Linear convention)
    up_weight:     (out_features, rank)  (nn.Linear convention)
    """
    orig_dtype = hidden_states.dtype
    *lead, in_features = hidden_states.shape
    rank, in_f2 = down_weight.shape
    out_features, rank2 = up_weight.shape
    assert in_features == in_f2 and rank == rank2
    assert down_weight.dtype == up_weight.dtype, "down/up weight dtypes must match"

    M = int(np.prod(lead)) if lead else 1
    x2 = hidden_states.reshape(M, in_features)
    w_dtype = down_weight.dtype

    # Lane-dense weight layouts:
    #   down.weight stays (rank, in_features)  -> in_features in the lane dim.
    #   up.weight transposed once (tiny array) -> (rank, out_features).
    wu_t = jnp.transpose(up_weight)  # (rank, out_features)

    scale = (float(network_alpha) / float(rank)) if network_alpha is not None else None

    vmem_limit, budget, dual_core = _vmem_limit_and_budget()

    x_bytes = jnp.dtype(orig_dtype).itemsize
    w_bytes = jnp.dtype(w_dtype).itemsize
    # Per-row VMEM: double-buffered x & out tiles + in-kernel compute-dtype
    # cast of x + f32 intermediates.
    per_row = (2 * in_features * x_bytes + 2 * out_features * x_bytes
               + in_features * w_bytes + out_features * 4 + rank * 4)
    # Weights are single-buffered (pl.Buffered(1)) -> counted once.
    weight_bytes = (rank * in_features + rank * out_features) * w_bytes

    TM = _choose_tile_m(M, per_row, weight_bytes, budget, dual_core)
    grid = (pl.cdiv(M, TM),)

    out = pl.pallas_call(
        partial(_lora_kernel, scale=scale),
        out_shape=jax.ShapeDtypeStruct((M, out_features), orig_dtype),
        grid=grid,
        in_specs=[
            pl.BlockSpec((TM, in_features), lambda i: (i, 0)),
            # Weights: constant index maps, stay resident; single buffer.
            pl.BlockSpec((rank, in_features), lambda i: (0, 0),
                         pipeline_mode=pl.Buffered(1)),
            pl.BlockSpec((rank, out_features), lambda i: (0, 0),
                         pipeline_mode=pl.Buffered(1)),
        ],
        out_specs=pl.BlockSpec((TM, out_features), lambda i: (i, 0)),
        compiler_params=pltpu.CompilerParams(
            dimension_semantics=("parallel",),
            vmem_limit_bytes=vmem_limit,
        ),
    )(x2, down_weight, wu_t)

    return out.reshape(*lead, out_features)


def _reference(hidden_states, down_weight, up_weight, network_alpha=None):
    orig_dtype = hidden_states.dtype
    dtype = down_weight.dtype
    down = jnp.dot(hidden_states.astype(dtype), down_weight.T)
    up = jnp.dot(down, up_weight.T)
    if network_alpha is not None:
        up = up * (network_alpha / down_weight.shape[0])
    return up.astype(orig_dtype)


if __name__ == "__main__":
    # Small shapes consistent with the module: batch=2, seq=8, hidden=32.
    batch, seq = 2, 8
    in_features, out_features, rank = 32, 32, 4
    network_alpha = 8.0

    key = jax.random.PRNGKey(0)
    kx, kd, ku, kx2 = jax.random.split(key, 4)

    x = jax.random.normal(kx, (batch, seq, in_features), dtype=jnp.float32)

    # Module-faithful init: down ~ N(0, (1/rank)^2), up = zeros.
    down_weight = (1.0 / rank) * jax.random.normal(
        kd, (rank, in_features), dtype=jnp.float32)
    up_weight = jnp.zeros((out_features, rank), dtype=jnp.float32)

    y = jax.block_until_ready(
        lora_linear_forward(x, down_weight, up_weight, network_alpha=network_alpha))
    np.testing.assert_allclose(
        np.asarray(y),
        np.asarray(_reference(x, down_weight, up_weight, network_alpha)),
        rtol=1e-5, atol=1e-5)

    # Non-zero up weights so the full two-matmul + scale path is exercised.
    up_weight_nz = 0.1 * jax.random.normal(ku, (out_features, rank),
                                           dtype=jnp.float32)
    y2 = jax.block_until_ready(
        lora_linear_forward(x, down_weight, up_weight_nz, network_alpha=network_alpha))
    np.testing.assert_allclose(
        np.asarray(y2),
        np.asarray(_reference(x, down_weight, up_weight_nz, network_alpha)),
        rtol=1e-5, atol=1e-5)

    # M not a multiple of 8 (exercises pl.cdiv grid + boundary masking), no alpha.
    x_odd = jax.random.normal(kx2, (1, 7, in_features), dtype=jnp.float32)
    y3 = jax.block_until_ready(
        lora_linear_forward(x_odd, down_weight, up_weight_nz, network_alpha=None))
    np.testing.assert_allclose(
        np.asarray(y3),
        np.asarray(_reference(x_odd, down_weight, up_weight_nz, None)),
        rtol=1e-5, atol=1e-5)

    # bf16 weight path: scale is applied in-kernel on the f32 accumulator, so
    # numerics match the module (which scales the matmul output, not weights).
    y4 = jax.block_until_ready(
        lora_linear_forward(x, down_weight.astype(jnp.bfloat16),
                            up_weight_nz.astype(jnp.bfloat16),
                            network_alpha=network_alpha))
    np.testing.assert_allclose(
        np.asarray(y4),
        np.asarray(_reference(x, down_weight.astype(jnp.bfloat16),
                              up_weight_nz.astype(jnp.bfloat16), network_alpha)),
        rtol=5e-2, atol=5e-2)

    print("KERNEL_OK")
</pallas_src>

<mosaic_0001>
module attributes {stable_mosaic.version = 11 : i64} {
  func.func @_lora_kernel(%arg0: i32, %arg1: memref<8x32xf32, #tpu.memory_space<vmem>>, %arg2: memref<4x32xf32, #tpu.memory_space<vmem>>, %arg3: memref<4x32xf32, #tpu.memory_space<vmem>>, %arg4: memref<8x32xf32, #tpu.memory_space<vmem>>) attributes {dimension_semantics = [#tpu.dimension_semantics<parallel>], iteration_bounds = array<i64: 2>, scalar_prefetch = 0 : i64, scratch_operands = 0 : i64, tpu.core_type = #tpu.core_type<tc>, window_params = [{transform_indices = @transform_0, window_bounds = array<i64: 8, 32>}, {pipeline_mode = #tpu.pipeline_mode<synchronous>, transform_indices = @transform_1, window_bounds = array<i64: 4, 32>}, {pipeline_mode = #tpu.pipeline_mode<synchronous>, transform_indices = @transform_2, window_bounds = array<i64: 4, 32>}, {transform_indices = @transform_3, window_bounds = array<i64: 8, 32>}]} {
    %c0 = arith.constant 0 : index
    %c0_0 = arith.constant 0 : index
    %0 = vector.load %arg1[%c0, %c0_0] : memref<8x32xf32, #tpu.memory_space<vmem>>, vector<8x32xf32>
    %c0_1 = arith.constant 0 : index
    %c0_2 = arith.constant 0 : index
    %1 = vector.load %arg2[%c0_1, %c0_2] : memref<4x32xf32, #tpu.memory_space<vmem>>, vector<4x32xf32>
    %cst = arith.constant dense<0.000000e+00> : vector<8x4xf32>
    %2 = tpu.matmul %0, %1, %cst {dimension_numbers = #tpu.dot_dimension_numbers<[1], [1], [0], [0], [0, 0, 1, 0], [], []>} : vector<8x32xf32>, vector<4x32xf32>, vector<8x4xf32> -> vector<8x4xf32>
    %c0_3 = arith.constant 0 : index
    %c0_4 = arith.constant 0 : index
    %3 = vector.load %arg3[%c0_3, %c0_4] : memref<4x32xf32, #tpu.memory_space<vmem>>, vector<4x32xf32>
    %cst_5 = arith.constant dense<0.000000e+00> : vector<8x32xf32>
    %4 = tpu.matmul %2, %3, %cst_5 {dimension_numbers = #tpu.dot_dimension_numbers<[1], [0], [0], [1], [0, 0, 1, 1], [], []>} : vector<8x4xf32>, vector<4x32xf32>, vector<8x32xf32> -> vector<8x32xf32>
    %cst_6 = arith.constant 2.000000e+00 : f32
    %5 = vector.broadcast %cst_6 : f32 to vector<8x32xf32>
    %6 = arith.mulf %4, %5 : vector<8x32xf32>
    %c0_7 = arith.constant 0 : index
    %c0_8 = arith.constant 0 : index
    %7 = vector.load %arg4[%c0_7, %c0_8] : memref<8x32xf32, #tpu.memory_space<vmem>>, vector<8x32xf32>
    tpu.vector_store %arg4[%c0_7, %c0_8], %6 {strides = array<i32>} : memref<8x32xf32, #tpu.memory_space<vmem>>, vector<8x32xf32>,
    return
  }
  func.func @transform_0(%arg0: i32) -> (i32, i32) {
    %c0_i32 = arith.constant 0 : i32
    %c0_i32_0 = arith.constant 0 : i32
    return %arg0, %c0_i32 : i32, i32
  }
  func.func @transform_1(%arg0: i32) -> (i32, i32) {
    %c0_i32 = arith.constant 0 : i32
    %c0_i32_0 = arith.constant 0 : i32
    %c0_i32_1 = arith.constant 0 : i32
    return %c0_i32, %c0_i32_0 : i32, i32
  }
  func.func @transform_2(%arg0: i32) -> (i32, i32) {
    %c0_i32 = arith.constant 0 : i32
    %c0_i32_0 = arith.constant 0 : i32
    %c0_i32_1 = arith.constant 0 : i32
    return %c0_i32, %c0_i32_0 : i32, i32
  }
  func.func @transform_3(%arg0: i32) -> (i32, i32) {
    %c0_i32 = arith.constant 0 : i32
    %c0_i32_0 = arith.constant 0 : i32
    return %arg0, %c0_i32 : i32, i32
  }
}

</mosaic_0001>

<bundles_post_ra>
// kernel: lora_linear_forward.1
= control target key start
LH: loop header
LB: loop body
LE: loop exit
PB: predicated region body
PF: predicated region fallthrough
CT: control target
= control target key end

     0   :  { %8 = vsyncpa [#allocation3], 0  ;;  %s800_s0 = inlined_call_operand.hbm [shape: f32[16,32], index: 0, kind: input, shape index: {}]   ;;  %s801_s1 = inlined_call_operand.vmem [shape: f32[4,32], index: 1, kind: input, shape index: {}]   ;;  %s802_s2 = inlined_call_operand.vmem [shape: f32[4,32], index: 2, kind: input, shape index: {}]   ;;  %s803_s3 = inlined_call_operand.hbm [shape: f32[16,32], index: 3, kind: output, shape index: {}]  }
   0x1   :  { %10 = vsyncpa [#allocation3 + $0x1], 0 }
   0x2   :  { %11 = vsyncpa [#allocation4], 0 }
   0x3   :  { %13 = vsyncpa [#allocation4 + $0x1], 0  ;;  %s630_s12 = smov 0   ;;  %s632_s13 = smov 0  }
   0x4   :  { %s634_s14 = smov 0   ;;  %s636_s15 = smov 0  }
   0x5 LB: > { %s651_s16 = sadd.s32 4294967295, %s604_s15   ;;  %s430_s17 = sadd.s32 4294967294, %s604_s15   ;;  %s604_s15 = sphi %s636_s15, %s818_s15   ;;  %s600_s14 = sphi %s634_s14, %s817_s14   ;;  %s596_s13 = sphi %s632_s13, %s816_s13   ;;  %s592_s12 = sphi %s630_s12, %s815_s12  }
   0x6   : > { %s655_s18 = sadd.s32 1, %s604_s15   ;;  %s26_s19 = sadd.s32 1, %s600_s14 }
   0x7   : > { %s23_s20 = ssub.s32 %s604_s15, %s655_s18  ;;  %p33_p0 = scmp.ne.s32.totalorder %s600_s14, %s596_s13 }
   0x8   : > { %p24_p1 = scmp.eq.s32.totalorder %s23_s20, 0  ;;  %p34_p2 = scmp.eq.s32.totalorder %s604_s15, 0 }
   0x9   : > { %p39_p3 = scmp.ne.s32.totalorder %s596_s13, %s592_s12  ;;  %p40_p4 = scmp.eq.s32.totalorder %s651_s16, 0 }
   0xa   : > { %s667_s21 = scalar_select %p24_p1, %s600_s14, %s26_s19  }
   0xb   : > { %p669_p5 = por %p34_p2, %p33_p0  ;;  %p673_p6 = por %p40_p4, %p39_p3 }
   0xc   : > { %p105_p7 = scmp.eq.s32.totalorder %s651_s16, 1  ;;  %p111_p8 = scmp.eq.s32.totalorder %s430_s17, 1 }
   0xd   : > { %p472_p10 = scmp.lt.s32.totalorder %s604_s15, 2  ;;  %s137_s26 = sand.u32 1, %s600_s14  }
   0xe   : > { %p680_p11 = por %p105_p7, %p33_p0  ;;  %p684_p12 = por %p111_p8, %p39_p3 }
   0xf   : > { %s434_s27 = sshll.u32 %s604_s15, 7  ;;  %s433_s28 = sshll.u32 %s137_s26, 3 }
  0x10   : > { %s807_s24 = scalar_select %p680_p11, 1, 0 }
  0x11   : > { %s808_s25 = scalar_select %p684_p12, 1, 0 }
  0x12   : > { %s693_s4 = scalar_lea.hbm %s800_s0, %s434_s27  ;;  %s141_s5 = scalar_lea.vmem [#allocation2], %s433_s28 }
  0x13   : > { %s148_s6 = sshll.u32 %s141_s5, 4  ;;  %p697_p13 = pnand %p472_p10, %p669_p5  ;;  %s701_s6 = int_to_ptr.vmem [resolvable:$true] %s148_s6 }
  0x14   : > { %s138_s8 = scalar_lea.sflag [#allocation3], %s137_s26  ;;  %s508_s9 = scalar_lea.hbm %s693_s4, 128 }
  0x15   : > { %p509_p2 = scmp.ne.s32.totalorder %s693_s4, %s508_s9  ;;  %p510_p3 = pneg %p697_p13 }
  0x16   : > { %s513_s17 = scalar_lea.hbm %s800_s0, 256  ;;  %p514_p5 = scmp.lt.u32.totalorder %s693_s4, %s800_s0 }
  0x17   : > { %p511_p4 = pnand %p510_p3, %p509_p2  ;;  %p515_p8 = scmp.lt.u32.totalorder %s513_s17, %s508_s9 }
  0x18   : > { %p517_p9 = scmp.lt.u32.totalorder %s508_s9, %s693_s4 }
  0x19   : > { %p512_p7 = pneg %p511_p4  ;;  %p516_p10 = por %p515_p8, %p514_p5 }
  0x1b   : > { %p518_p0 = por %p517_p9, %p516_p10 }
  0x1d   : > { %p519_p1 = pnand %p518_p0, %p512_p7 }
  0x1f   : > { %522 = shalt.err (!%p519_p1)
}
  0x20   : > { %s523_s22 = scalar_lea.vmem %s701_s6, 128  ;;  %s606_s26 = smov [#allocation2]  }
  0x21   : > { %p524_p2 = scmp.ne.s32.totalorder %s701_s6, %s523_s22  ;;  %s528_s27 = sshll.u32 %s606_s26, 4  ;;  %s529_s27 = int_to_ptr.vmem [resolvable:$false] %s528_s27 }
  0x22   : > { %s530_s28 = scalar_lea.vmem %s529_s27, 256  ;;  %p531_p11 = scmp.lt.s32.totalorder %s701_s6, %s529_s27 }
  0x23   : > { %p526_p4 = pnand %p524_p2, %p510_p3  ;;  %p532_p5 = scmp.lt.s32.totalorder %s530_s28, %s523_s22 }
  0x25   : > { %p527_p12 = pneg %p526_p4  ;;  %p533_p8 = por %p532_p5, %p531_p11 }
  0x27   : > { %p534_p9 = pnand %p533_p8, %p527_p12 }
  0x29   : > { %537 = shalt.err (!%p534_p9)
}
  0x2a   : > { %467 = dma.hbm_to_vmem [thread:$0]  (!%p697_p13), %s693_s4, 128, %s701_s6, %s138_s8  }
  0x2b   : > { %p810_p0 = scmp.lt.s32.totalorder %s604_s15, 3  ;;  %p811_p1 = scmp.ge.s32.totalorder %s604_s15, 1 }
  0x2d   : > { %p154_p3 = pnand %p811_p1, %p810_p0 }
  0x2e   : > { %s735_s29 = sand.u32 (!%p154_p3), 1, %s596_s13  }
  0x2f   : > { %157 = sbr.rel (%p154_p3) target bundleno = 501 (0x1f5), region = 32  ;;  %s436_s30 = sshll.u32 (!%p154_p3), %s735_s29, 3 }
  0x30   : > { %s160_s5 = scalar_lea.sflag (!%p154_p3), [#allocation3], %s735_s29  ;;  %s163_s9 = scalar_lea.vmem (!%p154_p3), [#allocation2], %s436_s30 }
  0x36   : > { %583 = dma.done.wait (%p673_p6), %s160_s5, 128  }
  0x37   : > { %585 = vsyncadd (%p673_p6), %s160_s5, 4294967168  ;;  %v607_v0 = vmov 0.0   ;;  %vm608_vm0 = vmmov 0   ;;  %vm188_vm1 = vcmask 261120   ;;  %v187_v1 = vld [vmem:[%s801_s1] sm:$0xf] }
  0x38   : > { %450 = vmatprep.subr.mxu0 %v607_v0  ;;  %452 = vmatprep.mubr.msk.f32.mxu0 %vm608_vm0, %v607_v0  ;;  %v186_v2 = vld [vmem:[%s163_s9] sm:$0xff]  ;;  %vm270_vm2 = vcmask 1043456   ;;  %vm266_vm3 = vcmask 31744   ;;  %s443_s8 = sshll.u32 %s651_s16, 7  ;;  %s185_s10 = scalar_lea.vmem [#allocation5], %s436_s30 }
  0x39   : > { %455 = vmatprep.subr.mxu1 %v607_v0  ;;  %457 = vmatprep.mubr.msk.f32.mxu1 %vm608_vm0, %v607_v0  ;;  %v265_v3 = vld [vmem:[%s802_s2] sm:$0xf]  ;;  %s360_s11 = sshll.u32 %s185_s10, 4  ;;  %s755_s20 = scalar_lea.hbm %s803_s3, %s443_s8  ;;  %s757_s11 = int_to_ptr.vmem [resolvable:$true] %s360_s11 }
  0x3a   : > { %451 = vmatpush3.xpose.msk.msra.mxu0 %vm188_vm1, %v187_v1  ;;  %456 = vmatpush3.msk.msra.mxu1 %vm270_vm2, %v265_v3  ;;  %s347_s22 = scalar_lea.sflag [#allocation4], %s735_s29  ;;  %s538_s26 = scalar_lea.vmem %s757_s11, 128 }
  0x3b   : > { %p539_p6 = scmp.ne.s32.totalorder %s757_s11, %s538_s26  ;;  %p812_p11 = scmp.ne.s32.totalorder %s807_s24, 0 }
  0x3c   : > { %s609_s16 = smov [#allocation5]  }
  0x3d   : > { %453 = vmatmul.mubr.msk.f32.vlgmr.msra.gmra.mrb[0].mxu0 %vm188_vm1, %v186_v2  ;;  %p540_p12 = pnand %p539_p6, %p812_p11  ;;  %s542_s27 = sshll.u32 %s609_s16, 4  ;;  %s543_s27 = int_to_ptr.vmem [resolvable:$false] %s542_s27 }
  0x3e   : > { %s544_s28 = scalar_lea.vmem %s543_s27, 256  ;;  %p545_p7 = scmp.lt.s32.totalorder %s757_s11, %s543_s27 }
  0x3f   : > { %p541_p13 = pneg %p540_p12  ;;  %p546_p10 = scmp.lt.s32.totalorder %s544_s28, %s538_s26 }
  0x41   : > { %p547_p2 = por %p546_p10, %p545_p7 }
  0x43   : > { %p548_p4 = pnand %p547_p2, %p541_p13 }
 0x110   : > { %v261_v4 = vpop.f32.mrb[0].mxu0 }
 0x111   : > { %v454_v5 = vpop.f32.mrb[1].mxu0  ;;  %458 = vmatmul.mubr.msk.f32.vlgmr.msra.gmra.mrb[0].mxu1 %vm266_vm3, %v261_v4 }
 0x1e4   : > { %v340_v6 = vpop.f32.mrb[0].mxu1 }
 0x1e5   : > { %v344_v7 = vmul.f32 2.0, %v340_v6  ;;  %v459_v8 = vpop.f32.mrb[1].mxu1 }
 0x1e7   : > { %345 = vst.msk [vmem:[%s185_s10] sm:$0xff] %vm188_vm1, %v344_v7 }
 0x1e8   : > { %551 = shalt.err (!%p548_p4)
}
 0x1e9   : > { %s552_s29 = scalar_lea.hbm %s755_s20, 128  ;;  %s556_s9 = scalar_lea.hbm %s803_s3, 256 }
 0x1ea   : > { %p553_p5 = scmp.ne.s32.totalorder %s755_s20, %s552_s29  ;;  %p557_p0 = scmp.lt.u32.totalorder %s755_s20, %s803_s3 }
 0x1eb   : > { %p558_p1 = scmp.lt.u32.totalorder %s556_s9, %s552_s29  ;;  %p560_p6 = scmp.lt.u32.totalorder %s552_s29, %s755_s20 }
 0x1ec   : > { %p554_p8 = pnand %p553_p5, %p812_p11 }
 0x1ed   : > { %p559_p3 = por %p558_p1, %p557_p0 }
 0x1ee   : > { %p555_p9 = pneg %p554_p8 }
 0x1ef   : > { %p561_p12 = por %p560_p6, %p559_p3 }
 0x1f1   : > { %p562_p13 = pnand %p561_p12, %p555_p9 }
 0x1f3   : > { %565 = shalt.err (!%p562_p13)
}
 0x1f4   : > { %462 = dma.vmem_to_hbm [thread:$0]  (%p812_p11), %s757_s11, 128, %s755_s20, %s347_s22  }
 0x1f5 PF: > { %s372_s7 = sand.u32 1, %s592_s12   ;;  %p813_p7 = scmp.ne.s32.totalorder %s808_s25, 0 }
 0x1f6   : > { %p814_p10 = scmp.ge.s32.totalorder %s604_s15, 2  ;;  %s373_s23 = scalar_lea.sflag [#allocation4], %s372_s7 }
 0x1f8   : > { %p469_p2 = pnand %p814_p10, %p813_p7 }
 0x1fa   : > { %587 = dma.done.wait (!%p469_p2), %s373_s23, 128  }
 0x1fb   : > { %589 = vsyncadd (!%p469_p2), %s373_s23, 4294967168  ;;  %p16_p4 = scmp.ge.s32.totalorder %s655_s18, 4   ;;  %s815_s12 = smov %s596_s13 }
 0x1fc   : > { %s816_s13 = smov %s600_s14  ;;  %s817_s14 = smov %s667_s21 }
 0x1fd   : > { %s818_s15 = smov %s655_s18  ;;  %18 = sbr.rel (!%p16_p4) target bundleno = 5 (0x5), region = 77 }
 0x204   :  { %378 = vsyncpa [#allocation3], 1 }
 0x205   :  { %380 = vsyncpa [#allocation3 + $0x1], 1 }
 0x206   :  { %381 = vsyncpa [#allocation4], 1 }
 0x207   :  { %383 = vsyncpa [#allocation4 + $0x1], 1 }

</bundles_post_ra>
